<compile_context>
chip_gen: v7x
topology: tpu7x:2x2x1
jax: 0.10.0
libtpu: 0.0.40
codegen_flags: <defaults>
</compile_context>

<pallas_src>
import numpy as np
import jax
import jax.numpy as jnp
from jax import lax
from jax.experimental import pallas as pl
from jax.experimental.pallas import tpu as pltpu


def block_kernel(x_ref, w_ref, b_ref, out_ref):
    # One fused MXU matmul: (TB, P) @ (P, 4P) -> (TB, 4P), f32 accumulation.
    y = jnp.dot(x_ref[...], w_ref[...], preferred_element_type=jnp.float32)
    y = y + b_ref[...]
    # ReLU only on the last P lanes (the x5 slot): VPU select, no XLU shuffle,
    # single unmasked lane-dense store.
    p4 = y.shape[-1]
    lane = lax.broadcasted_iota(jnp.int32, y.shape, dimension=1)
    y = jnp.where(lane >= 3 * (p4 // 4), jnp.maximum(y, 0.0), y)
    out_ref[...] = y.astype(out_ref.dtype)


def _choose_batch_tile(B):
    # Prefer large tiles (amortize ~0.35us/step) but keep >=2 grid steps so both
    # v7x TensorCores run; the extra step costs ~0.35us on 1-TC chips (negligible).
    for tb in (1024, 512, 256, 128, 64, 32, 16, 8):
        if B >= 2 * tb:
            return tb
    return 8  # tiny batches: single (padded) tile


def _compose_params(a, b, c, d, params, P):
    # Fold the affine chain + weighted skip into one weight/bias. Composed in
    # float64 on the host, cast to f32 (mathematically exact vs the reference).
    W = [np.asarray(params[f"w{i}"], dtype=np.float64) for i in range(1, 5)]
    bb = [np.asarray(params[f"b{i}"], dtype=np.float64) for i in range(1, 5)]
    A1 = W[0];            c1 = bb[0]                       # x1 = x0 @ A1^T + c1
    A2 = W[1] @ A1;       c2 = W[1] @ c1 + bb[1]           # x2
    A3 = W[2] @ A2;       c3 = W[2] @ c2 + bb[2]           # x3
    A4 = W[3] @ A3;       c4 = W[3] @ c3 + bb[3]           # x4
    A5 = a * np.eye(P) + b * A1 + c * A3 + d * A4          # pre-ReLU x5
    c5 = b * c1 + c * c3 + d * c4
    # (in, out) layout -> kernel contracts x0 @ W_big directly (no transposes).
    W_big = np.concatenate([A2.T, A3.T, A4.T, A5.T], axis=1)     # (P, 4P)
    b_big = np.concatenate([c2, c3, c4, c5])[None, :]            # (1, 4P)
    return jnp.asarray(W_big, jnp.float32), jnp.asarray(b_big, jnp.float32)


def block_forward(a, b, c, d, x0, params):
    """params: w1..w4 of shape (P, P) in PyTorch (out, in) layout, b1..b4 of shape (P,)."""
    B, P = x0.shape
    W_big, b_big = _compose_params(a, b, c, d, params, P)

    TB = _choose_batch_tile(B)
    Bp = pl.cdiv(B, TB) * TB
    x = x0 if Bp == B else jnp.pad(x0, ((0, Bp - B), (0, 0)))
    grid = (Bp // TB,)

    packed = pl.pallas_call(
        block_kernel,
        out_shape=jax.ShapeDtypeStruct((Bp, 4 * P), jnp.float32),
        grid=grid,
        in_specs=[
            pl.BlockSpec((TB, P), lambda i: (i, 0)),        # x0 (streamed over batch)
            pl.BlockSpec((P, 4 * P), lambda i: (0, 0)),     # fused weight (VMEM-resident)
            pl.BlockSpec((1, 4 * P), lambda i: (0, 0)),     # fused bias (VMEM-resident)
        ],
        out_specs=pl.BlockSpec((TB, 4 * P), lambda i: (i, 0)),
        compiler_params=pltpu.CompilerParams(
            dimension_semantics=("parallel",)),
    )(x, W_big, b_big)

    packed = packed[:B]
    x2 = packed[:, 0 * P:1 * P]
    x3 = packed[:, 1 * P:2 * P]
    x4 = packed[:, 2 * P:3 * P]
    x5 = packed[:, 3 * P:4 * P]
    return x2, x3, x4, x5


def reference_forward(a, b, c, d, x0, params):
    x1 = x0 @ params["w1"].T + params["b1"]
    x2 = x1 @ params["w2"].T + params["b2"]
    x3 = x2 @ params["w3"].T + params["b3"]
    x4 = x3 @ params["w4"].T + params["b4"]
    x5 = jnp.maximum(a * x0 + b * x1 + c * x3 + d * x4, 0.0)
    return x2, x3, x4, x5


if __name__ == "__main__":
    key = jax.random.PRNGKey(0)
    B, P = 128, 32  # 4*P == 128 -> lane-dense packed output; TB=64 -> grid=(2,)

    keys = jax.random.split(key, 9)
    bound = 1.0 / float(np.sqrt(P))
    params = {}
    for i in range(1, 5):
        params[f"w{i}"] = jax.random.uniform(
            keys[2 * (i - 1)], (P, P), jnp.float32, -bound, bound)
        params[f"b{i}"] = jax.random.uniform(
            keys[2 * (i - 1) + 1], (P,), jnp.float32, -bound, bound)

    x0 = jax.random.normal(keys[8], (B, P), jnp.float32)
    a, b, c, d = 0.5, 1.0, -0.3, 0.7

    outs = jax.block_until_ready(block_forward(a, b, c, d, x0, params))
    refs = reference_forward(a, b, c, d, x0, params)
    for o, r in zip(outs, refs):
        assert o.shape == r.shape
        assert jnp.allclose(o, r, atol=1e-3, rtol=1e-3), "mismatch vs reference"

    print("KERNEL_OK")
</pallas_src>

<mosaic_0001>
module attributes {stable_mosaic.version = 11 : i64} {
  func.func @block_kernel(%arg0: i32, %arg1: memref<64x32xf32, #tpu.memory_space<vmem>>, %arg2: memref<32x128xf32, #tpu.memory_space<vmem>>, %arg3: memref<1x128xf32, #tpu.memory_space<vmem>>, %arg4: memref<64x128xf32, #tpu.memory_space<vmem>>) attributes {dimension_semantics = [#tpu.dimension_semantics<parallel>], iteration_bounds = array<i64: 2>, scalar_prefetch = 0 : i64, scratch_operands = 0 : i64, tpu.core_type = #tpu.core_type<tc>, window_params = [{transform_indices = @transform_0, window_bounds = array<i64: 64, 32>}, {pipeline_mode = #tpu.pipeline_mode<synchronous>, transform_indices = @transform_1, window_bounds = array<i64: 32, 128>}, {pipeline_mode = #tpu.pipeline_mode<synchronous>, transform_indices = @transform_2, window_bounds = array<i64: 1, 128>}, {transform_indices = @transform_3, window_bounds = array<i64: 64, 128>}]} {
    %c0 = arith.constant 0 : index
    %c0_0 = arith.constant 0 : index
    %0 = vector.load %arg1[%c0, %c0_0] : memref<64x32xf32, #tpu.memory_space<vmem>>, vector<64x32xf32>
    %c0_1 = arith.constant 0 : index
    %c0_2 = arith.constant 0 : index
    %1 = vector.load %arg2[%c0_1, %c0_2] : memref<32x128xf32, #tpu.memory_space<vmem>>, vector<32x128xf32>
    %cst = arith.constant dense<0.000000e+00> : vector<64x128xf32>
    %2 = tpu.matmul %0, %1, %cst {dimension_numbers = #tpu.dot_dimension_numbers<[1], [0], [0], [1], [0, 0, 1, 1], [], []>} : vector<64x32xf32>, vector<32x128xf32>, vector<64x128xf32> -> vector<64x128xf32>
    %c0_3 = arith.constant 0 : index
    %c0_4 = arith.constant 0 : index
    %3 = vector.load %arg3[%c0_3, %c0_4] : memref<1x128xf32, #tpu.memory_space<vmem>>, vector<1x128xf32>
    %4 = vector.broadcast %3 : vector<1x128xf32> to vector<64x128xf32>
    %5 = arith.addf %2, %4 : vector<64x128xf32>
    %6 = tpu.iota {dimensions = array<i32: 1>} : vector<64x128xi32>
    %c96_i32 = arith.constant 96 : i32
    %7 = vector.broadcast %c96_i32 : i32 to vector<64x128xi32>
    %8 = arith.cmpi sge, %6, %7 : vector<64x128xi32>
    %cst_5 = arith.constant 0.000000e+00 : f32
    %9 = vector.broadcast %cst_5 : f32 to vector<64x128xf32>
    %10 = arith.maximumf %5, %9 : vector<64x128xf32>
    %11 = arith.select %8, %10, %5 : vector<64x128xi1>, vector<64x128xf32>
    %c0_6 = arith.constant 0 : index
    %c0_7 = arith.constant 0 : index
    %12 = vector.load %arg4[%c0_6, %c0_7] : memref<64x128xf32, #tpu.memory_space<vmem>>, vector<64x128xf32>
    tpu.vector_store %arg4[%c0_6, %c0_7], %11 {strides = array<i32>} : memref<64x128xf32, #tpu.memory_space<vmem>>, vector<64x128xf32>,
    return
  }
  func.func @transform_0(%arg0: i32) -> (i32, i32) {
    %c0_i32 = arith.constant 0 : i32
    %c0_i32_0 = arith.constant 0 : i32
    return %arg0, %c0_i32 : i32, i32
  }
  func.func @transform_1(%arg0: i32) -> (i32, i32) {
    %c0_i32 = arith.constant 0 : i32
    %c0_i32_0 = arith.constant 0 : i32
    %c0_i32_1 = arith.constant 0 : i32
    return %c0_i32, %c0_i32_0 : i32, i32
  }
  func.func @transform_2(%arg0: i32) -> (i32, i32) {
    %c0_i32 = arith.constant 0 : i32
    %c0_i32_0 = arith.constant 0 : i32
    %c0_i32_1 = arith.constant 0 : i32
    return %c0_i32, %c0_i32_0 : i32, i32
  }
  func.func @transform_3(%arg0: i32) -> (i32, i32) {
    %c0_i32 = arith.constant 0 : i32
    %c0_i32_0 = arith.constant 0 : i32
    return %arg0, %c0_i32 : i32, i32
  }
}

</mosaic_0001>

<bundles_post_ra>
// kernel: tpu_custom_call.1
= control target key start
LH: loop header
LB: loop body
LE: loop exit
PB: predicated region body
PF: predicated region fallthrough
CT: control target
= control target key end

     0   :  { %8 = vsyncpa [#allocation3], 0  ;;  %s755_s0 = inlined_call_operand.vmem [shape: f32[128,32], index: 0, kind: input, shape index: {}]   ;;  %s756_s1 = inlined_call_operand.vmem [shape: f32[32,128], index: 1, kind: input, shape index: {}]   ;;  %s757_s2 = inlined_call_operand.vmem [shape: f32[1,128], index: 2, kind: input, shape index: {}]   ;;  %s758_s3 = inlined_call_operand.hbm [shape: f32[128,128], index: 3, kind: output, shape index: {}]  }
   0x1   :  { %10 = vsyncpa [#allocation3 + $0x1], 0  ;;  %s618_s12 = smov 0   ;;  %s620_s13 = smov 0  }
   0x2   :  { %s622_s14 = smov 0   ;;  %s624_s15 = smov 0  }
   0x3 LB: > { %s639_s16 = sadd.s32 4294967295, %s593_s15   ;;  %s424_s17 = sadd.s32 4294967294, %s593_s15   ;;  %s593_s15 = sphi %s624_s15, %s764_s15   ;;  %s589_s14 = sphi %s622_s14, %s763_s14   ;;  %s585_s13 = sphi %s620_s13, %s762_s13   ;;  %s581_s12 = sphi %s618_s12, %s761_s12  }
   0x4   : > { %s643_s18 = sadd.s32 1, %s593_s15   ;;  %s91_s19 = sadd.s32 1, %s589_s14 }
   0x5   : > { %s88_s20 = ssub.s32 %s593_s15, %s643_s18  ;;  %p101_p0 = scmp.ne.s32.totalorder %s589_s14, %s585_s13 }
   0x6   : > { %p89_p1 = scmp.eq.s32.totalorder %s88_s20, 0  ;;  %p102_p2 = scmp.eq.s32.totalorder %s639_s16, 1 }
   0x7   : > { %p107_p3 = scmp.ne.s32.totalorder %s585_s13, %s581_s12  ;;  %p108_p4 = scmp.eq.s32.totalorder %s424_s17, 1 }
   0x8   : > { %s654_s21 = scalar_select %p89_p1, %s589_s14, %s91_s19  }
   0x9   : > { %p656_p5 = por %p102_p2, %p101_p0  ;;  %p660_p6 = por %p108_p4, %p107_p3 }
   0xa   : > { %p427_p7 = scmp.ge.s32.totalorder %s593_s15, 1  ;;  %p141_p8 = scmp.lt.s32.totalorder %s593_s15, 3 }
   0xc   : > { %p142_p9 = pnand %p427_p7, %p141_p8 }
   0xd   : > { %v180_v0 = vld [vmem:[%s756_s1] sm:$0xff] (!%p142_p9)  ;;  %v181_v1 = vld [vmem:[%s756_s1 + $0x8] sm:$0xff] (!%p142_p9)  ;;  %v182_v2 = vld [vmem:[%s756_s1 + $0x10] sm:$0xff] (!%p142_p9)  ;;  %s429_s30 = sshll.u32 (!%p142_p9), %s639_s16, 3  ;;  %vm191_vm0 = vcmask (!%p142_p9), 261120   ;;  %v321_v14 = vlaneseq (!%p142_p9)  ;;  %s162_s10 = sand.u32 (!%p142_p9), 1, %s585_s13  }
   0xe   : > { %145 = sbr.rel (%p142_p9) target bundleno = 264 (0x108), region = 32  ;;  %v478_v3 = vpack.c.bf16 (!%p142_p9), %v181_v1, %v180_v0  ;;  %v183_v4 = vld [vmem:[%s756_s1 + $0x18] sm:$0xff] (!%p142_p9)  ;;  %p166_p10 = scmp.lt.s32.totalorder (!%p142_p9), %s429_s30, 15  ;;  %v431_v15 = vld [vmem:[%s757_s2] ss:$0 sm:$0xff] (!%p142_p9) }
   0xf   : > { %v482_v5 = vpack.c.bf16 (!%p142_p9), %v183_v4, %v182_v2  ;;  %v322_v16 = vand.u32 (!%p142_p9), 127, %v321_v14  ;;  %s428_s19 = sshll.u32 (!%p142_p9), %s162_s10, 6  ;;  %s445_s20 = sshll.u32 (!%p142_p9), %s639_s16, 10 }
  0x10   : > { %479 = vmatprep.subr.bf16.mxu0 (!%p142_p9), %v478_v3  ;;  %486 = vmatprep.subr.bf16.mxu1 (!%p142_p9), %v478_v3  ;;  %s164_s24 = scalar_lea.vmem (!%p142_p9), [#allocation2], %s428_s19  ;;  %s704_s27 = scalar_lea.hbm (!%p142_p9), %s758_s3, %s445_s20 }
  0x11   : > { %481 = vmatpush3.bf16.msra.mxu0 (!%p142_p9), %v478_v3  ;;  %488 = vmatpush3.bf16.msra.mxu1 (!%p142_p9), %v478_v3  ;;  %vm323_vm1 = vcmp.ge.s32.totalorder (!%p142_p9), %v322_v16, 96  ;;  %s362_s25 = sshll.u32 (!%p142_p9), %s164_s24, 4  ;;  %s714_s28 = scalar_lea.sflag (!%p142_p9), [#allocation3], %s162_s10  ;;  %s706_s25 = int_to_ptr.vmem [resolvable:$true] %s362_s25 }
  0x12   : > { %483 = vmatprep.subr.bf16.mxu0 (!%p142_p9), %v482_v5  ;;  %487 = vmatprep.subr.bf16.mxu1 (!%p142_p9), %v482_v5  ;;  %s531_s29 = scalar_lea.vmem (!%p142_p9), %s706_s25, 1024 }
  0x13   : > { %p532_p11 = scmp.ne.s32.totalorder (!%p142_p9), %s706_s25, %s531_s29 }
  0x15   : > { %s766_s30 = smov (!%p166_p10, %s429_s30), 15  ;;  %485 = vmatpush3.bf16.msra.mxu0 %v482_v5  ;;  %489 = vmatpush3.bf16.msra.mxu1 %v482_v5  ;;  %p533_p12 = pnand %p532_p11, %p656_p5 }
  0x16   : > { %s430_s6 = sshll.u32 %s766_s30, 3  ;;  %s595_s30 = smov [#allocation2]  }
  0x17   : > { %s169_s9 = scalar_lea.vmem %s755_s0, %s430_s6  ;;  %p534_p13 = pneg %p533_p12 }
  0x18   : > { %v172_v6 = vld [vmem:[%s169_s9] sm:$0xff]  ;;  %v173_v8 = vld [vmem:[%s169_s9 + $0x8] sm:$0xff]  ;;  %v174_v10 = vld [vmem:[%s169_s9 + $0x10] sm:$0xff]  ;;  %s535_s4 = sshll.u32 %s595_s30, 4  ;;  %s536_s4 = int_to_ptr.vmem [resolvable:$false] %s535_s4 }
  0x19   : > { %v176_v7 = vld [vmem:[%s169_s9 + $0x20] sm:$0xff]  ;;  %v177_v9 = vld [vmem:[%s169_s9 + $0x28] sm:$0xff]  ;;  %466 = vmatprep.mubr.msk.f32.mxu0 %vm191_vm0, %v172_v6  ;;  %v178_v11 = vld [vmem:[%s169_s9 + $0x30] sm:$0xff]  ;;  %s537_s5 = scalar_lea.vmem %s536_s4, 2048  ;;  %p538_p0 = scmp.lt.s32.totalorder %s706_s25, %s536_s4 }
  0x1a   : > { %472 = vmatprep.mubr.msk.f32.mxu1 %vm191_vm0, %v176_v7  ;;  %467 = vmatmul.mubr.msk.f32.vlgmr.msra.gmra.mrb[0].mxu0 %vm191_vm0, %v173_v8  ;;  %v175_v12 = vld [vmem:[%s169_s9 + $0x18] sm:$0xff]  ;;  %p539_p1 = scmp.lt.s32.totalorder %s537_s5, %s531_s29 }
  0x1b   : > { %473 = vmatmul.mubr.msk.f32.vlgmr.msra.gmra.mrb[0].mxu1 %vm191_vm0, %v177_v9  ;;  %469 = vmatprep.mubr.msk.f32.mxu0 %vm191_vm0, %v174_v10  ;;  %v179_v13 = vld [vmem:[%s169_s9 + $0x38] sm:$0xff] }
  0x1c   : > { %475 = vmatprep.mubr.msk.f32.mxu1 %vm191_vm0, %v178_v11  ;;  %p540_p2 = por %p539_p1, %p538_p0 }
  0x1e   : > { %470 = vmatmul.mubr.msk.f32.gmra.mrb[2].mxu0 %vm191_vm0, %v175_v12  ;;  %p541_p3 = pnand %p540_p2, %p534_p13 }
  0x1f   : > { %476 = vmatmul.mubr.msk.f32.gmra.mrb[2].mxu1 %vm191_vm0, %v179_v13 }
  0xed   : > { %v468_v17 = vpop.f32.mrb[0].mxu0 }
  0xee   : > { %v474_v18 = vpop.f32.mrb[0].mxu1  ;;  %v288_v19 = vadd.f32 %v468_v17, %v431_v15  ;;  %v282_v21 = vpop.f32.mrb[1].mxu0 }
  0xef   : > { %v308_v20 = vadd.f32 %v474_v18, %v431_v15  ;;  %v302_v22 = vpop.f32.mrb[1].mxu1  ;;  %v283_v23 = vadd.f32 %v431_v15, %v282_v21 }
  0xf0   : > { %v303_v24 = vadd.f32 %v431_v15, %v302_v22  ;;  %v325_v25 = vmax.f32 %v288_v19, 0.0 }
  0xf1   : > { %v329_v26 = vmax.f32 %v308_v20, 0.0  ;;  %v324_v27 = vmax.f32 %v283_v23, 0.0  ;;  %v471_v29 = vpop.f32.mrb[2].mxu0 }
  0xf2   : > { %v328_v28 = vmax.f32 %v303_v24, 0.0  ;;  %v477_v30 = vpop.f32.mrb[2].mxu1  ;;  %v333_v31 = vsel %vm323_vm1, %v325_v25, %v288_v19  ;;  %v298_v33 = vadd.f32 %v471_v29, %v431_v15  ;;  %v292_v35 = vpop.f32.mrb[3].mxu0 }
  0xf3   : > { %v337_v32 = vsel %vm323_vm1, %v329_v26, %v308_v20  ;;  %v318_v34 = vadd.f32 %v477_v30, %v431_v15  ;;  %v312_v36 = vpop.f32.mrb[3].mxu1  ;;  %341 = vst [vmem:[%s164_s24 + $0x8] sm:$0xff] %v333_v31  ;;  %v332_v37 = vsel %vm323_vm1, %v324_v27, %v283_v23  ;;  %v293_v39 = vadd.f32 %v431_v15, %v292_v35 }
  0xf4   : > { %345 = vst [vmem:[%s164_s24 + $0x28] sm:$0xff] %v337_v32  ;;  %v336_v38 = vsel %vm323_vm1, %v328_v28, %v303_v24  ;;  %v313_v40 = vadd.f32 %v431_v15, %v312_v36  ;;  %340 = vst [vmem:[%s164_s24] sm:$0xff] %v332_v37  ;;  %v327_v41 = vmax.f32 %v298_v33, 0.0 }
  0xf5   : > { %344 = vst [vmem:[%s164_s24 + $0x20] sm:$0xff] %v336_v38  ;;  %v331_v42 = vmax.f32 %v318_v34, 0.0  ;;  %v326_v43 = vmax.f32 %v293_v39, 0.0 }
  0xf6   : > { %v330_v44 = vmax.f32 %v313_v40, 0.0  ;;  %v335_v45 = vsel %vm323_vm1, %v327_v41, %v298_v33 }
  0xf7   : > { %v339_v46 = vsel %vm323_vm1, %v331_v42, %v318_v34  ;;  %343 = vst [vmem:[%s164_s24 + $0x18] sm:$0xff] %v335_v45  ;;  %v334_v47 = vsel %vm323_vm1, %v326_v43, %v293_v39 }
  0xf8   : > { %347 = vst [vmem:[%s164_s24 + $0x38] sm:$0xff] %v339_v46  ;;  %v338_v48 = vsel %vm323_vm1, %v330_v44, %v313_v40  ;;  %342 = vst [vmem:[%s164_s24 + $0x10] sm:$0xff] %v334_v47 }
  0xf9   : > { %346 = vst [vmem:[%s164_s24 + $0x30] sm:$0xff] %v338_v48 }
  0xfa   : > { %544 = shalt.err (!%p541_p3)
}
  0xfb   : > { %s545_s6 = scalar_lea.hbm %s704_s27, 1024  ;;  %s549_s9 = scalar_lea.hbm %s758_s3, 2048 }
  0xfc   : > { %p546_p4 = scmp.ne.s32.totalorder %s704_s27, %s545_s6  ;;  %p550_p9 = scmp.lt.u32.totalorder %s704_s27, %s758_s3 }
  0xfd   : > { %p551_p10 = scmp.lt.u32.totalorder %s549_s9, %s545_s6  ;;  %p553_p12 = scmp.lt.u32.totalorder %s545_s6, %s704_s27 }
  0xfe   : > { %p547_p7 = pnand %p546_p4, %p656_p5 }
  0xff   : > { %p552_p11 = por %p551_p10, %p550_p9 }
 0x100   : > { %p548_p8 = pneg %p547_p7 }
 0x101   : > { %p554_p13 = por %p553_p12, %p552_p11 }
 0x103   : > { %p555_p0 = pnand %p554_p13, %p548_p8 }
 0x105   : > { %558 = shalt.err (!%p555_p0)
}
 0x106   : > { %s596_s17 = smov 128   ;;  %s597_s19 = smov 8  }
 0x107   : > { %490 = dma.vmem_to_hbm [thread:$0]  (%p656_p5), %s706_s25, 1024, %s704_s27, %s714_s28, %s596_s17, %s596_s17, %s597_s19  }
 0x108 PF: > { %p496_p1 = scmp.ge.s32.totalorder %s593_s15, 2  ;;  %s377_s20 = sand.u32 1, %s581_s12  }
 0x109   : > { %s378_s24 = scalar_lea.sflag [#allocation3], %s377_s20 }
 0x10a   : > { %p493_p2 = pnand %p496_p1, %p660_p6 }
 0x10c   : > { %576 = dma.done.wait (!%p493_p2), %s378_s24, 1024  }
 0x10d   : > { %578 = vsyncadd (!%p493_p2), %s378_s24, 4294966272  ;;  %p13_p3 = scmp.ge.s32.totalorder %s643_s18, 4   ;;  %s761_s12 = smov %s585_s13 }
 0x10e   : > { %s762_s13 = smov %s589_s14  ;;  %s763_s14 = smov %s654_s21 }
 0x10f   : > { %s764_s15 = smov %s643_s18  ;;  %15 = sbr.rel (!%p13_p3) target bundleno = 3 (0x3), region = 67 }
 0x116   :  { %383 = vsyncpa [#allocation3], 1 }
 0x117   :  { %385 = vsyncpa [#allocation3 + $0x1], 1 }

</bundles_post_ra>
